<compile_context>
chip_gen: v7x
topology: tpu7x:2x2x1
jax: 0.10.0
libtpu: 0.0.40
codegen_flags: <defaults>
</compile_context>

<pallas_src>
import functools

import jax
import jax.numpy as jnp
from jax.experimental import pallas as pl
from jax.experimental.pallas import tpu as pltpu


def _round_up(a, b):
    return ((a + b - 1) // b) * b


def dagn_conv_kernel(adj_ref, x_ref, rel_ref, gamma_ref, beta_ref,
                     wc_ref, bc_ref, ent_ref, *, d_real, tile_m, mm_dtype):
    """One dst-node tile per grid step.

    adj_ref:   (TM, R*Npad)   dense adjacency slab for this tile's dst rows
    x_ref:     (Npad, Dpad)   full entity embeddings (needed for all sources)
    rel_ref:   (R, Dpad)      relation embeddings
    gamma/beta:(1, Dpad)      LayerNorm affine (zero-padded lanes)
    wc/bc:     (Dpad, Dpad) / (1, Dpad)  conv output linear
    ent_ref:   (TM, Dpad)     conv(norm(x)) + x   <- the value DAGNLayer returns
    """
    # --- LayerNorm over the REAL hidden dim for all nodes (padded lanes = 0,
    #     so sums over the padded axis are exact; eps = 1e-5, torch default).
    x_all = x_ref[...].astype(jnp.float32)                       # (Npad, Dpad)
    inv_d = jnp.float32(1.0 / d_real)
    mean = jnp.sum(x_all, axis=-1, keepdims=True) * inv_d
    ex2 = jnp.sum(x_all * x_all, axis=-1, keepdims=True) * inv_d
    var = jnp.maximum(ex2 - mean * mean, 0.0)                    # biased (torch)
    h = (x_all - mean) * jax.lax.rsqrt(var + 1e-5)
    h = h * gamma_ref[...].astype(jnp.float32) + beta_ref[...].astype(jnp.float32)
    # dropout(p=0.0) -> identity

    # --- messages for every (relation, src) pair, flattened along K ---
    rel = rel_ref[...].astype(jnp.float32)                       # (R, Dpad)
    msg = (rel[:, None, :] * h[None, :, :]).reshape(-1, h.shape[-1])  # (R*Npad, Dpad)

    # --- fused relational aggregation: ONE MXU matmul with K = R*Npad ---
    agg = jnp.dot(adj_ref[...].astype(mm_dtype), msg.astype(mm_dtype),
                  preferred_element_type=jnp.float32)            # (TM, Dpad)

    # --- conv output linear ---
    conv = jnp.dot(agg.astype(mm_dtype), wc_ref[...].astype(mm_dtype),
                   preferred_element_type=jnp.float32)
    conv = conv + bc_ref[...].astype(jnp.float32)

    # --- residual with this tile's rows of the ORIGINAL x ---
    row0 = pl.multiple_of(pl.program_id(0) * tile_m, 8)
    x_tile = x_ref[pl.ds(row0, tile_m), :].astype(jnp.float32)
    ent_ref[...] = (conv + x_tile).astype(ent_ref.dtype)

    # NOTE: the original module's MLP branch is dead code (typo'd variable
    # "entitiy_embed" is never returned), so it is intentionally omitted here.


def build_dense_adjacency(edge_index, edge_type, num_nodes, num_relations,
                          out_dtype=jnp.bfloat16):
    """Glue (plain JAX): scatter edges into dense [R, N, N] (dst, src)."""
    src, dst = edge_index[0], edge_index[1]
    adj = jnp.zeros((num_relations, num_nodes, num_nodes), jnp.float32)
    adj = adj.at[edge_type, dst, src].add(1.0)   # duplicate edges accumulate
    return adj.astype(out_dtype)


def dagn_layer_forward(entity_embed, relation_embed, edge_index, edge_type,
                       params, *, mm_dtype=jnp.bfloat16, tile_m=None):
    n, d = entity_embed.shape
    r = relation_embed.shape[0]

    # --- lane-dense padding ----------------------------------------------
    d_pad = _round_up(d, 128)
    n_pad = _round_up(n, 8)
    if tile_m is None:
        # >=2 tiles when possible (megacore on v7x), capped at 256 dst rows.
        tile_m = max(8, min(256, _round_up(-(-n_pad // 2), 8)))
    n_pad = _round_up(n_pad, tile_m)
    grid_m = n_pad // tile_m

    def pad2(a, rows, cols):
        return jnp.pad(a, ((0, rows - a.shape[0]), (0, cols - a.shape[1])))

    x_p = pad2(entity_embed.astype(jnp.float32), n_pad, d_pad)
    rel_p = pad2(relation_embed.astype(jnp.float32), r, d_pad)
    # gamma/beta padded with ZEROS so padded lanes of the normalized h are 0.
    gamma_p = pad2(params["gamma"].reshape(1, d).astype(jnp.float32), 1, d_pad)
    beta_p = pad2(params["beta"].reshape(1, d).astype(jnp.float32), 1, d_pad)
    wc_p = pad2(params["wc"].astype(jnp.float32), d_pad, d_pad)
    bc_p = pad2(params["bc"].reshape(1, d).astype(jnp.float32), 1, d_pad)

    # Dense adjacency at padded size, reshaped to a lane-contiguous slab
    # (N_dst, R*N_src) so the kernel does a single K = R*Npad matmul.
    adj = build_dense_adjacency(edge_index, edge_type, n_pad, r, mm_dtype)
    adj_cat = jnp.transpose(adj, (1, 0, 2)).reshape(n_pad, r * n_pad)

    # --- VMEM budget from chosen tiles (double-buffered tiles + residents) --
    mm_bytes = jnp.dtype(mm_dtype).itemsize
    adj_tile_b = tile_m * r * n_pad * mm_bytes
    out_tile_b = tile_m * d_pad * 4
    resident_b = (n_pad * d_pad + r * d_pad + 3 * d_pad + d_pad * d_pad) * 4
    tmp_b = r * n_pad * d_pad * (4 + mm_bytes) + n_pad * d_pad * 4
    est = 2 * (adj_tile_b + out_tile_b) + 2 * resident_b + tmp_b + (8 << 20)
    vmem_limit = int(min(64 << 20, max(32 << 20, est)))

    kernel = functools.partial(dagn_conv_kernel, d_real=d, tile_m=tile_m,
                               mm_dtype=mm_dtype)

    ent_p = pl.pallas_call(
        kernel,
        out_shape=jax.ShapeDtypeStruct((n_pad, d_pad), entity_embed.dtype),
        grid=(grid_m,),
        in_specs=[
            pl.BlockSpec((tile_m, r * n_pad), lambda i: (i, 0)),   # adj tile
            pl.BlockSpec((n_pad, d_pad), lambda i: (0, 0)),        # x (full)
            pl.BlockSpec((r, d_pad), lambda i: (0, 0)),            # rel
            pl.BlockSpec((1, d_pad), lambda i: (0, 0)),            # gamma
            pl.BlockSpec((1, d_pad), lambda i: (0, 0)),            # beta
            pl.BlockSpec((d_pad, d_pad), lambda i: (0, 0)),        # wc
            pl.BlockSpec((1, d_pad), lambda i: (0, 0)),            # bc
        ],
        out_specs=pl.BlockSpec((tile_m, d_pad), lambda i: (i, 0)),
        compiler_params=pltpu.CompilerParams(
            dimension_semantics=("parallel",),
            vmem_limit_bytes=vmem_limit),
    )(adj_cat, x_p, rel_p, gamma_p, beta_p, wc_p, bc_p)

    # Matches the PyTorch return: conv(dropout(norm(x))) + x.
    return ent_p[:n, :d]


def make_params(key, d, h):
    k = jax.random.split(key, 4)
    scale_d = 1.0 / jnp.sqrt(jnp.float32(d))
    scale_h = 1.0 / jnp.sqrt(jnp.float32(h))
    return {
        "gamma": jnp.ones((d,), jnp.float32),
        "beta": jnp.zeros((d,), jnp.float32),
        "wc": jax.random.normal(k[0], (d, d), jnp.float32) * scale_d,
        "bc": jnp.zeros((d,), jnp.float32),
        # mlp params kept for interface parity but unused (dead branch):
        "w1": jax.random.normal(k[1], (d, h), jnp.float32) * scale_d,
        "b1": jnp.zeros((h,), jnp.float32),
        "w2": jax.random.normal(k[2], (h, d), jnp.float32) * scale_h,
        "b2": jnp.zeros((d,), jnp.float32),
    }


if __name__ == "__main__":
    N, D, R, E, H = 16, 32, 4, 24, 64

    key = jax.random.PRNGKey(0)
    k_x, k_rel, k_src, k_dst, k_typ, k_par = jax.random.split(key, 6)

    entity_embed = jax.random.normal(k_x, (N, D), jnp.float32)
    relation_embed = jax.random.normal(k_rel, (R, D), jnp.float32)
    edge_index = jnp.stack(
        [jax.random.randint(k_src, (E,), 0, N),
         jax.random.randint(k_dst, (E,), 0, N)], axis=0).astype(jnp.int32)
    edge_type = jax.random.randint(k_typ, (E,), 0, R).astype(jnp.int32)

    params = make_params(k_par, D, H)

    out = dagn_layer_forward(entity_embed, relation_embed, edge_index,
                             edge_type, params)
    jax.block_until_ready(out)
    assert out.shape == (N, D) and out.dtype == jnp.float32
    assert bool(jnp.all(jnp.isfinite(out)))
    print("KERNEL_OK")
</pallas_src>

<mosaic_0001>
module attributes {stable_mosaic.version = 11 : i64} {
  func.func @dagn_conv_kernel(%arg0: i32, %arg1: memref<8x64xbf16, #tpu.memory_space<vmem>>, %arg2: memref<16x128xf32, #tpu.memory_space<vmem>>, %arg3: memref<4x128xf32, #tpu.memory_space<vmem>>, %arg4: memref<1x128xf32, #tpu.memory_space<vmem>>, %arg5: memref<1x128xf32, #tpu.memory_space<vmem>>, %arg6: memref<128x128xf32, #tpu.memory_space<vmem>>, %arg7: memref<1x128xf32, #tpu.memory_space<vmem>>, %arg8: memref<8x128xf32, #tpu.memory_space<vmem>>) attributes {dimension_semantics = [#tpu.dimension_semantics<parallel>], iteration_bounds = array<i64: 2>, scalar_prefetch = 0 : i64, scratch_operands = 0 : i64, tpu.core_type = #tpu.core_type<tc>, window_params = [{transform_indices = @transform_0, window_bounds = array<i64: 8, 64>}, {pipeline_mode = #tpu.pipeline_mode<synchronous>, transform_indices = @transform_1, window_bounds = array<i64: 16, 128>}, {pipeline_mode = #tpu.pipeline_mode<synchronous>, transform_indices = @transform_2, window_bounds = array<i64: 4, 128>}, {pipeline_mode = #tpu.pipeline_mode<synchronous>, transform_indices = @transform_3, window_bounds = array<i64: 1, 128>}, {pipeline_mode = #tpu.pipeline_mode<synchronous>, transform_indices = @transform_4, window_bounds = array<i64: 1, 128>}, {pipeline_mode = #tpu.pipeline_mode<synchronous>, transform_indices = @transform_5, window_bounds = array<i64: 128, 128>}, {pipeline_mode = #tpu.pipeline_mode<synchronous>, transform_indices = @transform_6, window_bounds = array<i64: 1, 128>}, {transform_indices = @transform_7, window_bounds = array<i64: 8, 128>}]} {
    %c0 = arith.constant 0 : index
    %c0_0 = arith.constant 0 : index
    %0 = vector.load %arg2[%c0, %c0_0] : memref<16x128xf32, #tpu.memory_space<vmem>>, vector<16x128xf32>
    %cst = arith.constant dense<0.000000e+00> : vector<16xf32>
    %1 = vector.multi_reduction <add>, %0, %cst [1] : vector<16x128xf32> to vector<16xf32>
    %2 = vector.shape_cast %1 : vector<16xf32> to vector<16x1xf32>
    %cst_1 = arith.constant 3.125000e-02 : f32
    %3 = vector.broadcast %cst_1 : f32 to vector<16x1xf32>
    %4 = arith.mulf %2, %3 : vector<16x1xf32>
    %5 = arith.mulf %0, %0 : vector<16x128xf32>
    %cst_2 = arith.constant dense<0.000000e+00> : vector<16xf32>
    %6 = vector.multi_reduction <add>, %5, %cst_2 [1] : vector<16x128xf32> to vector<16xf32>
    %7 = vector.shape_cast %6 : vector<16xf32> to vector<16x1xf32>
    %cst_3 = arith.constant 3.125000e-02 : f32
    %8 = vector.broadcast %cst_3 : f32 to vector<16x1xf32>
    %9 = arith.mulf %7, %8 : vector<16x1xf32>
    %10 = arith.mulf %4, %4 : vector<16x1xf32>
    %11 = arith.subf %9, %10 : vector<16x1xf32>
    %cst_4 = arith.constant 0.000000e+00 : f32
    %12 = vector.broadcast %cst_4 : f32 to vector<16x1xf32>
    %13 = arith.maximumf %11, %12 : vector<16x1xf32>
    %14 = vector.broadcast %4 : vector<16x1xf32> to vector<16x128xf32>
    %15 = arith.subf %0, %14 : vector<16x128xf32>
    %cst_5 = arith.constant 9.99999974E-6 : f32
    %16 = vector.broadcast %cst_5 : f32 to vector<16x1xf32>
    %17 = arith.addf %13, %16 : vector<16x1xf32>
    %18 = math.rsqrt %17 : vector<16x1xf32>
    %19 = vector.broadcast %18 : vector<16x1xf32> to vector<16x128xf32>
    %20 = arith.mulf %15, %19 : vector<16x128xf32>
    %c0_6 = arith.constant 0 : index
    %c0_7 = arith.constant 0 : index
    %21 = vector.load %arg4[%c0_6, %c0_7] : memref<1x128xf32, #tpu.memory_space<vmem>>, vector<1x128xf32>
    %22 = vector.broadcast %21 : vector<1x128xf32> to vector<16x128xf32>
    %23 = arith.mulf %20, %22 : vector<16x128xf32>
    %c0_8 = arith.constant 0 : index
    %c0_9 = arith.constant 0 : index
    %24 = vector.load %arg5[%c0_8, %c0_9] : memref<1x128xf32, #tpu.memory_space<vmem>>, vector<1x128xf32>
    %25 = vector.broadcast %24 : vector<1x128xf32> to vector<16x128xf32>
    %26 = arith.addf %23, %25 : vector<16x128xf32>
    %c0_10 = arith.constant 0 : index
    %c0_11 = arith.constant 0 : index
    %27 = vector.load %arg3[%c0_10, %c0_11] : memref<4x128xf32, #tpu.memory_space<vmem>>, vector<4x128xf32>
    %28 = vector.shape_cast %27 : vector<4x128xf32> to vector<4x1x128xf32>
    %29 = vector.shape_cast %26 : vector<16x128xf32> to vector<1x16x128xf32>
    %30 = vector.broadcast %28 : vector<4x1x128xf32> to vector<4x16x128xf32>
    %31 = vector.broadcast %29 : vector<1x16x128xf32> to vector<4x16x128xf32>
    %32 = arith.mulf %30, %31 : vector<4x16x128xf32>
    %33 = vector.shape_cast %32 : vector<4x16x128xf32> to vector<64x128xf32>
    %c0_12 = arith.constant 0 : index
    %c0_13 = arith.constant 0 : index
    %34 = vector.load %arg1[%c0_12, %c0_13] : memref<8x64xbf16, #tpu.memory_space<vmem>>, vector<8x64xbf16>
    %35 = arith.truncf %33 : vector<64x128xf32> to vector<64x128xbf16>
    %cst_14 = arith.constant dense<0.000000e+00> : vector<8x128xf32>
    %36 = tpu.matmul %34, %35, %cst_14 {dimension_numbers = #tpu.dot_dimension_numbers<[1], [0], [0], [1], [0, 0, 1, 1], [], []>} : vector<8x64xbf16>, vector<64x128xbf16>, vector<8x128xf32> -> vector<8x128xf32>
    %37 = arith.truncf %36 : vector<8x128xf32> to vector<8x128xbf16>
    %c0_15 = arith.constant 0 : index
    %c0_16 = arith.constant 0 : index
    %38 = vector.load %arg6[%c0_15, %c0_16] : memref<128x128xf32, #tpu.memory_space<vmem>>, vector<128x128xf32>
    %39 = arith.truncf %38 : vector<128x128xf32> to vector<128x128xbf16>
    %cst_17 = arith.constant dense<0.000000e+00> : vector<8x128xf32>
    %40 = tpu.matmul %37, %39, %cst_17 {dimension_numbers = #tpu.dot_dimension_numbers<[1], [0], [0], [1], [0, 0, 1, 1], [], []>} : vector<8x128xbf16>, vector<128x128xbf16>, vector<8x128xf32> -> vector<8x128xf32>
    %c0_18 = arith.constant 0 : index
    %c0_19 = arith.constant 0 : index
    %41 = vector.load %arg7[%c0_18, %c0_19] : memref<1x128xf32, #tpu.memory_space<vmem>>, vector<1x128xf32>
    %42 = vector.broadcast %41 : vector<1x128xf32> to vector<8x128xf32>
    %43 = arith.addf %40, %42 : vector<8x128xf32>
    %c8_i32 = arith.constant 8 : i32
    %44 = arith.muli %arg0, %c8_i32 : i32
    %45 = tpu.assume_multiple %44, 8 : i32
    %46 = arith.index_cast %45 : i32 to index
    %c0_20 = arith.constant 0 : index
    %47 = vector.load %arg2[%46, %c0_20] : memref<16x128xf32, #tpu.memory_space<vmem>>, vector<8x128xf32>
    %48 = arith.addf %43, %47 : vector<8x128xf32>
    %c0_21 = arith.constant 0 : index
    %c0_22 = arith.constant 0 : index
    %49 = vector.load %arg8[%c0_21, %c0_22] : memref<8x128xf32, #tpu.memory_space<vmem>>, vector<8x128xf32>
    tpu.vector_store %arg8[%c0_21, %c0_22], %48 {strides = array<i32>} : memref<8x128xf32, #tpu.memory_space<vmem>>, vector<8x128xf32>,
    return
  }
  func.func @transform_0(%arg0: i32) -> (i32, i32) {
    %c0_i32 = arith.constant 0 : i32
    %c0_i32_0 = arith.constant 0 : i32
    return %arg0, %c0_i32 : i32, i32
  }
  func.func @transform_1(%arg0: i32) -> (i32, i32) {
    %c0_i32 = arith.constant 0 : i32
    %c0_i32_0 = arith.constant 0 : i32
    %c0_i32_1 = arith.constant 0 : i32
    return %c0_i32, %c0_i32_0 : i32, i32
  }
  func.func @transform_2(%arg0: i32) -> (i32, i32) {
    %c0_i32 = arith.constant 0 : i32
    %c0_i32_0 = arith.constant 0 : i32
    %c0_i32_1 = arith.constant 0 : i32
    return %c0_i32, %c0_i32_0 : i32, i32
  }
  func.func @transform_3(%arg0: i32) -> (i32, i32) {
    %c0_i32 = arith.constant 0 : i32
    %c0_i32_0 = arith.constant 0 : i32
    %c0_i32_1 = arith.constant 0 : i32
    return %c0_i32, %c0_i32_0 : i32, i32
  }
  func.func @transform_4(%arg0: i32) -> (i32, i32) {
    %c0_i32 = arith.constant 0 : i32
    %c0_i32_0 = arith.constant 0 : i32
    %c0_i32_1 = arith.constant 0 : i32
    return %c0_i32, %c0_i32_0 : i32, i32
  }
  func.func @transform_5(%arg0: i32) -> (i32, i32) {
    %c0_i32 = arith.constant 0 : i32
    %c0_i32_0 = arith.constant 0 : i32
    %c0_i32_1 = arith.constant 0 : i32
    return %c0_i32, %c0_i32_0 : i32, i32
  }
  func.func @transform_6(%arg0: i32) -> (i32, i32) {
    %c0_i32 = arith.constant 0 : i32
    %c0_i32_0 = arith.constant 0 : i32
    %c0_i32_1 = arith.constant 0 : i32
    return %c0_i32, %c0_i32_0 : i32, i32
  }
  func.func @transform_7(%arg0: i32) -> (i32, i32) {
    %c0_i32 = arith.constant 0 : i32
    %c0_i32_0 = arith.constant 0 : i32
    return %arg0, %c0_i32 : i32, i32
  }
}

</mosaic_0001>

<bundles_post_ra>
// kernel: tpu_custom_call.1
= control target key start
LH: loop header
LB: loop body
LE: loop exit
PB: predicated region body
PF: predicated region fallthrough
CT: control target
= control target key end

     0   :  { %12 = vsyncpa [#allocation3], 0  ;;  %s1280_s0 = inlined_call_operand.hbm [shape: bf16[16,64], index: 0, kind: input, shape index: {}]   ;;  %s1281_s1 = inlined_call_operand.hbm [shape: f32[16,128], index: 1, kind: input, shape index: {}]   ;;  %s1282_s2 = inlined_call_operand.vmem [shape: f32[4,128], index: 2, kind: input, shape index: {}]   ;;  %s1283_s3 = inlined_call_operand.vmem [shape: f32[1,128], index: 3, kind: input, shape index: {}]   ;;  %s1284_s4 = inlined_call_operand.vmem [shape: f32[1,128], index: 4, kind: input, shape index: {}]   ;;  %s1285_s5 = inlined_call_operand.hbm [shape: f32[128,128], index: 5, kind: input, shape index: {}]   ;;  %s1286_s6 = inlined_call_operand.vmem [shape: f32[1,128], index: 6, kind: input, shape index: {}]   ;;  %s1287_s7 = inlined_call_operand.hbm [shape: f32[16,128], index: 7, kind: output, shape index: {}]  }
   0x1   :  { %14 = vsyncpa [#allocation3 + $0x1], 0 }
   0x2   :  { %15 = vsyncpa [#allocation6], 0 }
   0x3   :  { %16 = vsyncpa [#allocation4], 0 }
   0x4   :  { %18 = vsyncpa [#allocation4 + $0x1], 0  ;;  %s1008_s24 = smov 0   ;;  %s1010_s25 = smov 0  }
   0x5   :  { %s1012_s26 = smov 0   ;;  %s1014_s27 = smov 0  }
   0x6 LB: > { %s1029_s28 = sadd.s32 4294967295, %s957_s27   ;;  %s657_s29 = sadd.s32 4294967294, %s957_s27   ;;  %s957_s27 = sphi %s1014_s27, %s1307_s27   ;;  %s953_s26 = sphi %s1012_s26, %s1306_s26   ;;  %s949_s25 = sphi %s1010_s25, %s1305_s25   ;;  %s945_s24 = sphi %s1008_s24, %s1304_s24  }
   0x7   : > { %p44_p0 = scmp.ne.s32.totalorder %s949_s25, %s945_s24  ;;  %p1288_p1 = scmp.eq.s32.totalorder %s1029_s28, 0 }
   0x8   : > { %p200_p3 = scmp.eq.s32.totalorder %s657_s29, 1  ;;  %p658_p5 = scmp.ge.s32.totalorder %s957_s27, 1 }
   0x9   : > { %p1038_p4 = por %p1288_p1, %p44_p0  ;;  %p207_p7 = scmp.lt.s32.totalorder %s957_s27, 3 }
   0xa   : > { %p1043_p6 = por %p200_p3, %p44_p0  ;;  %s959_s10 = smov [#allocation5]  }
   0xb   : > { %s1291_s30 = scalar_select %p1038_p4, 1, 0 }
   0xc   : > { %s1292_s8 = scalar_select %p1043_p6, 1, 0 }
   0xd   : > { %p1048_p8 = pnand %p658_p5, %p207_p7  ;;  %s219_s11 = sshll.u32 %s959_s10, 4  ;;  %s1052_s11 = int_to_ptr.vmem [resolvable:$true] %s219_s11 }
   0xe   : > { %s960_s13 = smov [#allocation7]   ;;  %s801_s17 = scalar_lea.hbm %s1281_s1, 256 }
   0xf   : > { %p737_p9 = pneg %p1048_p8  ;;  %s241_s14 = sshll.u32 %s960_s13, 4  ;;  %s1063_s14 = int_to_ptr.vmem [resolvable:$true] %s241_s14 }
  0x10   : > { %p802_p12 = scmp.ne.s32.totalorder %s1281_s1, %s801_s17  ;;  %p808_p5 = scmp.lt.u32.totalorder %s801_s17, %s1281_s1 }
  0x11   : > { %p1059_p11 = pnand %p737_p9, %p1288_p1 }
  0x13   : > { %p803_p13 = pneg %p1059_p11 }
  0x15   : > { %p804_p0 = pnand %p803_p13, %p802_p12 }
  0x17   : > { %p805_p3 = pneg %p804_p0 }
  0x19   : > { %p810_p7 = pnand %p808_p5, %p805_p3 }
  0x1b   : > { %813 = shalt.err (!%p810_p7)
}
  0x1c   : > { %s814_s22 = scalar_lea.vmem %s1052_s11, 256  ;;  %p822_p2 = scmp.lt.s32.totalorder %s1052_s11, %s1052_s11 }
  0x1d   : > { %p815_p9 = scmp.ne.s32.totalorder %s1052_s11, %s814_s22  ;;  %p823_p12 = scmp.lt.s32.totalorder %s814_s22, %s814_s22 }
  0x1f   : > { %p817_p10 = pnand %p815_p9, %p803_p13  ;;  %p824_p0 = por %p823_p12, %p822_p2 }
  0x21   : > { %p818_p1 = pneg %p817_p10 }
  0x23   : > { %p825_p6 = pnand %p824_p0, %p818_p1 }
  0x25   : > { %828 = shalt.err (!%p825_p6)
}
  0x26   : > { %s961_s23 = smov 128   ;;  %s962_s29 = smov 8  }
  0x27   : > { %740 = dma.hbm_to_vmem [thread:$0]  (!%p1059_p11), %s1281_s1, 256, %s1052_s11, [#allocation6], %s961_s23, %s961_s23, %s962_s29  }
  0x28   : > { %s829_s17 = scalar_lea.hbm %s1285_s5, 2048 }
  0x29   : > { %p830_p2 = scmp.ne.s32.totalorder %s1285_s5, %s829_s17  ;;  %p836_p10 = scmp.lt.u32.totalorder %s829_s17, %s1285_s5 }
  0x2b   : > { %p832_p1 = pnand %p830_p2, %p803_p13 }
  0x2d   : > { %p833_p6 = pneg %p832_p1 }
  0x2f   : > { %p838_p3 = pnand %p836_p10, %p833_p6 }
  0x31   : > { %841 = shalt.err (!%p838_p3)
}
  0x32   : > { %s842_s11 = scalar_lea.vmem %s1063_s14, 2048  ;;  %p850_p12 = scmp.lt.s32.totalorder %s1063_s14, %s1063_s14 }
  0x33   : > { %p843_p5 = scmp.ne.s32.totalorder %s1063_s14, %s842_s11  ;;  %p851_p0 = scmp.lt.s32.totalorder %s842_s11, %s842_s11 }
  0x35   : > { %p845_p7 = pnand %p843_p5, %p803_p13  ;;  %p852_p2 = por %p851_p0, %p850_p12 }
  0x37   : > { %p846_p9 = pneg %p845_p7 }
  0x39   : > { %p853_p1 = pnand %p852_p2, %p846_p9 }
  0x3b   : > { %856 = shalt.err (!%p853_p1)
}
  0x3c   : > { %743 = dma.hbm_to_vmem [thread:$0]  (!%p1059_p11), %s1285_s5, 2048, %s1063_s14, [#allocation6], %s961_s23, %s961_s23, %s962_s29  }
  0x3d   : > { %s1118_s13 = sadd.s32 1, %s957_s27   ;;  %s31_s12 = sadd.s32 1, %s953_s26 }
  0x3e   : > { %s28_s15 = ssub.s32 %s957_s27, %s1118_s13  ;;  %p38_p13 = scmp.ne.s32.totalorder %s953_s26, %s949_s25 }
  0x3f   : > { %p29_p6 = scmp.eq.s32.totalorder %s28_s15, 0  ;;  %p39_p10 = scmp.eq.s32.totalorder %s957_s27, 0 }
  0x40   : > { %p1295_p3 = scmp.eq.s32.totalorder %s1029_s28, 1  ;;  %p754_p7 = scmp.lt.s32.totalorder %s957_s27, 2 }
  0x41   : > { %s1134_s17 = scalar_select %p29_p6, %s953_s26, %s31_s12  }
  0x42   : > { %p1128_p5 = por %p1295_p3, %p38_p13  ;;  %p40_p9 = por %p39_p10, %p38_p13 }
  0x43   : > { %s258_s18 = sand.u32 1, %s953_s26   ;;  %s663_s14 = sshll.u32 %s957_s27, 6 }
  0x44   : > { %s1296_s16 = scalar_select %p1128_p5, 1, 0 }
  0x45   : > { %s662_s19 = sshll.u32 %s258_s18, 2  ;;  %s1141_s20 = scalar_lea.hbm %s1280_s0, %s663_s14 }
  0x46   : > { %s262_s21 = scalar_lea.vmem [#allocation2], %s662_s19  ;;  %p1145_p11 = pnand %p754_p7, %p40_p9 }
  0x47   : > { %s269_s11 = sshll.u32 %s262_s21, 4  ;;  %s259_s10 = scalar_lea.sflag [#allocation3], %s258_s18  ;;  %s1143_s11 = int_to_ptr.vmem [resolvable:$true] %s269_s11 }
  0x48   : > { %s857_s12 = scalar_lea.hbm %s1141_s20, 64  ;;  %p859_p0 = pneg %p1145_p11 }
  0x49   : > { %p858_p12 = scmp.ne.s32.totalorder %s1141_s20, %s857_s12  ;;  %s862_s14 = scalar_lea.hbm %s1280_s0, 128 }
  0x4a   : > { %p863_p13 = scmp.lt.u32.totalorder %s1141_s20, %s1280_s0  ;;  %p864_p6 = scmp.lt.u32.totalorder %s862_s14, %s857_s12 }
  0x4b   : > { %p860_p2 = pnand %p859_p0, %p858_p12  ;;  %p866_p3 = scmp.lt.u32.totalorder %s857_s12, %s1141_s20 }
  0x4c   : > { %p865_p10 = por %p864_p6, %p863_p13 }
  0x4d   : > { %p861_p1 = pneg %p860_p2 }
  0x4e   : > { %p867_p7 = por %p866_p3, %p865_p10 }
  0x50   : > { %p868_p9 = pnand %p867_p7, %p861_p1 }
  0x52   : > { %871 = shalt.err (!%p868_p9)
}
  0x53   : > { %s872_s18 = scalar_lea.vmem %s1143_s11, 64  ;;  %s963_s21 = smov [#allocation2]  }
  0x54   : > { %p873_p12 = scmp.ne.s32.totalorder %s1143_s11, %s872_s18  ;;  %s877_s15 = sshll.u32 %s963_s21, 4  ;;  %s878_s15 = int_to_ptr.vmem [resolvable:$false] %s877_s15 }
  0x55   : > { %s879_s19 = scalar_lea.vmem %s878_s15, 128  ;;  %p880_p4 = scmp.lt.s32.totalorder %s1143_s11, %s878_s15 }
  0x56   : > { %p875_p2 = pnand %p873_p12, %p859_p0  ;;  %p881_p13 = scmp.lt.s32.totalorder %s879_s19, %s872_s18 }
  0x58   : > { %p876_p5 = pneg %p875_p2  ;;  %p882_p6 = por %p881_p13, %p880_p4 }
  0x5a   : > { %p883_p10 = pnand %p882_p6, %p876_p5 }
  0x5c   : > { %886 = shalt.err (!%p883_p10)
}
  0x5d   : > { %747 = dma.hbm_to_vmem [thread:$0]  (!%p1145_p11), %s1141_s20, 64, %s1143_s11, %s259_s10  }
  0x5e   : > { %278 = sbr.rel (%p1048_p8) target bundleno = 742 (0x2e6), region = 48  ;;  %s1177_s12 = sand.u32 (!%p1048_p8), 1, %s949_s25  }
  0x5f   : > { %s665_s14 = sshll.u32 (!%p1048_p8), %s1177_s12, 2  ;;  %s281_s23 = scalar_lea.sflag (!%p1048_p8), [#allocation3], %s1177_s12 }
  0x60   : > { %s1181_s29 = scalar_lea.vmem (!%p1048_p8), [#allocation2], %s665_s14  ;;  %p1298_p4 = scmp.ne.s32.totalorder (!%p1048_p8), %s1291_s30, 0 }
  0x65   : > { %932 = dma.done.wait (%p1298_p4), %s281_s23, 64  }
  0x66   : > { %934 = vsyncadd (%p1298_p4), %s281_s23, 4294967232  ;;  %p1299_p5 = scmp.eq.s32.totalorder %s1029_s28, 0 }
  0x68   : > { %936 = dma.done.wait (%p1299_p5), [#allocation6], 2304   ;;  %p1300_p8 = pmov %p1299_p5 }
  0x69   : > { %v1191_v0 = vld [vmem:[#allocation5] sm:$0xff]  ;;  %v1193_v1 = vld [vmem:[#allocation5 + $0x8] sm:$0xff]  ;;  %v964_v4 = vmov 0.0   ;;  %vm965_vm0 = vmmov 0   ;;  %v476_v5 = vld [vmem:[#allocation7] sm:$0xff]  ;;  %v385_v44 = vlaneseq  ;;  %vm431_vm1 = vcmask 523264  }
  0x6a   : > { %938 = vsyncadd (%p1300_p8), [#allocation6], 4294964992  ;;  %326 = vadd.xlane.f32.xlu0 %v1191_v0  ;;  %v332_v2 = vmul.f32 %v1191_v0, %v1191_v0  ;;  %v333_v3 = vmul.f32 %v1193_v1, %v1193_v1  ;;  %693 = vmatprep.subr.bf16.mxu0 %v964_v4  ;;  %v477_v6 = vld [vmem:[#allocation7 + $0x8] sm:$0xff]  ;;  %v478_v7 = vld [vmem:[#allocation7 + $0x10] sm:$0xff]  ;;  %v966_v42 = vmov 1966171168  }
  0x6b   : > { %705 = vmatprep.subr.bf16.mxu1 %v964_v4  ;;  %701 = vmatprep.mubr.msk.bf16.mxu0 %vm965_vm0, %v964_v4  ;;  %v492_v8 = vpack.c.bf16 %v477_v6, %v476_v5  ;;  %v479_v9 = vld [vmem:[#allocation7 + $0x18] sm:$0xff]  ;;  %v480_v11 = vld [vmem:[#allocation7 + $0x20] sm:$0xff]  ;;  %v481_v12 = vld [vmem:[#allocation7 + $0x28] sm:$0xff]  ;;  %v383_v43 = vunpack.c.l.s4 %v966_v42  ;;  %v386_v46 = vshrl.u32 %v385_v44, 7  ;;  %s674_s18 = sshll.u32 %s1029_s28, 3  ;;  %s668_s21 = sshll.u32 %s1177_s12, 3 }
  0x6c   : > { %334 = vadd.xlane.f32.xlu1 %v332_v2  ;;  %721 = vmatprep.mubr.msk.bf16.mxu1 %vm965_vm0, %v964_v4  ;;  %v493_v10 = vpack.c.bf16 %v479_v9, %v478_v7  ;;  %v494_v13 = vpack.c.bf16 %v481_v12, %v480_v11  ;;  %v482_v14 = vld [vmem:[#allocation7 + $0x30] sm:$0xff]  ;;  %v483_v15 = vld [vmem:[#allocation7 + $0x38] sm:$0xff]  ;;  %v484_v17 = vld [vmem:[#allocation7 + $0x40] sm:$0xff]  ;;  %s548_s14 = scalar_lea.vmem [#allocation5], %s674_s18  ;;  %s676_s23 = sshll.u32 %s1029_s28, 7 }
  0x6d   : > { %706 = vmatpush3.bf16.msra.mxu1 %v492_v8  ;;  %v495_v16 = vpack.c.bf16 %v483_v15, %v482_v14  ;;  %v485_v18 = vld [vmem:[#allocation7 + $0x48] sm:$0xff]  ;;  %v486_v20 = vld [vmem:[#allocation7 + $0x50] sm:$0xff]  ;;  %v487_v21 = vld [vmem:[#allocation7 + $0x58] sm:$0xff]  ;;  %v384_v45 = vunpack.c.0.s8 %v383_v43  ;;  %v400_v55 = vsub.s32 0, %v386_v46  ;;  %s1236_s11 = scalar_lea.hbm %s1287_s7, %s676_s23  ;;  %s553_s22 = scalar_lea.sflag [#allocation4], %s1177_s12 }
  0x6e   : > { %328 = vadd.xlane.f32.xlu0 %v1193_v1  ;;  %707 = vmatprep.subr.bf16.mxu1 %v964_v4  ;;  %v496_v19 = vpack.c.bf16 %v485_v18, %v484_v17  ;;  %v497_v22 = vpack.c.bf16 %v487_v21, %v486_v20  ;;  %v488_v23 = vld [vmem:[#allocation7 + $0x60] sm:$0xff]  ;;  %v489_v24 = vld [vmem:[#allocation7 + $0x68] sm:$0xff]  ;;  %v490_v21 = vld [vmem:[#allocation7 + $0x70] sm:$0xff]  ;;  %p1301_p0 = scmp.ne.s32.totalorder %s1296_s16, 0  ;;  %s967_s10 = smov [#allocation8]  }
  0x6f   : > { %v498_v25 = vpack.c.bf16 %v489_v24, %v488_v23  ;;  %v669_v49 = vld [vmem:[%s1283_s3] ss:$0 sm:$0xff]  ;;  %v387_v51 = vsub.s32 %v384_v45, %v386_v46  ;;  %s891_s18 = sshll.u32 %s967_s10, 4  ;;  %s892_s18 = int_to_ptr.vmem [resolvable:$false] %s891_s18 }
  0x70   : > { %336 = vadd.xlane.f32.xlu1 %v333_v3  ;;  %v671_v52 = vld.sshfl [vmem:[%s1282_s2] sm:$0x33 pattern:$0x75316420] }
  0x71   : > { %708 = vmatpush3.bf16.msra.mxu1 %v493_v10  ;;  %v670_v57 = vld [vmem:[%s1284_s4] ss:$0 sm:$0xff]  ;;  %v381_v59 = vcombine.high %v671_v52, %v671_v52  ;;  %v388_v60 = vrot.slane %v671_v52, %v387_v51 }
  0x72   : > { %709 = vmatprep.subr.bf16.mxu1 %v964_v4  ;;  %v426_v20 = vld [vmem:[%s1181_s29] sm:$0xf]  ;;  %s322_s29 = scalar_lea.vmem [#allocation8], %s668_s21  ;;  %s893_s21 = scalar_lea.vmem %s892_s18, 256 }
  0x73   : > { %v401_v63 = vrot.slane %v388_v60, %v400_v55  ;;  %v395_v2 = vrot.slane %v381_v59, %v387_v51  ;;  %v396_v3 = vcombine.high %v388_v60, %v388_v60  ;;  %s566_s30 = sshll.u32 %s322_s29, 4  ;;  %s1238_s30 = int_to_ptr.vmem [resolvable:$true] %s566_s30 }
  0x74   : > { %s887_s28 = scalar_lea.vmem %s1238_s30, 128  ;;  %p894_p7 = scmp.lt.s32.totalorder %s1238_s30, %s892_s18 }
  0x75   : > { %710 = vmatpush3.bf16.msra.mxu1 %v494_v13  ;;  %v405_v7 = vrot.slane %v395_v2, %v400_v55  ;;  %v409_v10 = vrot.slane %v396_v3, %v400_v55  ;;  %v397_v11 = vcombine.high %v395_v2, %v395_v2  ;;  %p888_p11 = scmp.ne.s32.totalorder %s1238_s30, %s887_s28  ;;  %p895_p9 = scmp.lt.s32.totalorder %s893_s21, %s887_s28 }
  0x76   : > { %711 = vmatprep.subr.bf16.mxu1 %v964_v4 }
  0x77   : > { %v413_v15 = vrot.slane %v397_v11, %v400_v55  ;;  %p889_p1 = pnand %p888_p11, %p1301_p0  ;;  %p896_p12 = por %p895_p9, %p894_p7 }
  0x79   : > { %712 = vmatpush3.bf16.msra.mxu1 %v495_v16  ;;  %p890_p3 = pneg %p889_p1 }
  0x7a   : > { %713 = vmatprep.subr.bf16.mxu1 %v964_v4 }
  0x7b   : > { %p897_p2 = pnand %p896_p12, %p890_p3 }
  0x7d   : > { %714 = vmatpush3.bf16.msra.mxu1 %v496_v19 }
  0x7e   : > { %715 = vmatprep.subr.bf16.mxu1 %v964_v4 }
  0x81   : > { %716 = vmatpush3.bf16.msra.mxu1 %v497_v22  ;;  %v491_v22 = vld [vmem:[#allocation7 + $0x78] sm:$0xff] }
  0x82   : > { %717 = vmatprep.subr.bf16.mxu1 %v964_v4  ;;  %v499_v23 = vpack.c.bf16 %v491_v22, %v490_v21 }
  0x85   : > { %718 = vmatpush3.bf16.msra.mxu1 %v498_v25 }
  0x86   : > { %719 = vmatprep.subr.bf16.mxu1 %v964_v4 }
  0x89   : > { %720 = vmatpush3.bf16.msra.mxu1 %v499_v23 }
  0xf7   : > { %v327_v26 = vpop.xlane.xlu0 %326 }
  0xf8   : > { %v330_v27 = vmul.f32 0.03125, %v327_v26 }
  0xf9   : > { %v335_v28 = vpop.xlane.xlu1 %334 }
  0xfa   : > { %v340_v29 = vmul.f32 %v330_v27, %v330_v27  ;;  %v338_v30 = vmul.f32 0.03125, %v335_v28  ;;  %v346_v47 = vsub.f32 %v1191_v0, %v330_v27 }
  0xfb   : > { %v329_v31 = vpop.xlane.xlu0 %328 }
  0xfc   : > { %v342_v32 = vsub.f32 %v338_v30, %v340_v29  ;;  %v331_v33 = vmul.f32 0.03125, %v329_v31  ;;  %v549_v30 = vld [vmem:[%s548_s14] sm:$0xff] }
  0xfd   : > { %v337_v34 = vpop.xlane.xlu1 %336 }
  0xfe   : > { %v344_v35 = vmax.f32 %v342_v32, 0.0  ;;  %v341_v36 = vmul.f32 %v331_v33, %v331_v33  ;;  %v339_v37 = vmul.f32 0.03125, %v337_v34  ;;  %v347_v53 = vsub.f32 %v1193_v1, %v331_v33 }
 0x100   : > { %v348_v38 = vadd.f32 1e-05, %v344_v35  ;;  %v343_v39 = vsub.f32 %v339_v37, %v341_v36 }
 0x102   : > { %797 = vrsqrt.f32 %v348_v38  ;;  %v345_v40 = vmax.f32 %v343_v39, 0.0 }
 0x104   : > { %v349_v41 = vadd.f32 1e-05, %v345_v40 }
 0x106   : > { %799 = vrsqrt.f32 %v349_v41 }
 0x10c   : > { %v798_v48 = vpop.eup %797 }
 0x10d   : > { %v352_v50 = vmul.f32 %v798_v48, %v346_v47 }
 0x10f   : > { %v361_v54 = vmul.f32 %v669_v49, %v352_v50 }
 0x110   : > { %v800_v56 = vpop.eup %799 }
 0x111   : > { %v353_v58 = vmul.f32 %v800_v56, %v347_v53  ;;  %v370_v62 = vadd.f32 %v670_v57, %v361_v54 }
 0x113   : > { %v362_v61 = vmul.f32 %v669_v49, %v353_v58  ;;  %v418_v5 = vmul.f32 %v401_v63, %v370_v62  ;;  %v420_v9 = vmul.f32 %v405_v7, %v370_v62  ;;  %v422_v14 = vmul.f32 %v409_v10, %v370_v62 }
 0x114   : > { %v424_v18 = vmul.f32 %v413_v15, %v370_v62 }
 0x115   : > { %v371_v0 = vadd.f32 %v670_v57, %v362_v61 }
 0x117   : > { %v419_v6 = vmul.f32 %v401_v63, %v371_v0  ;;  %v421_v8 = vmul.f32 %v405_v7, %v371_v0  ;;  %v423_v13 = vmul.f32 %v409_v10, %v371_v0  ;;  %v425_v17 = vmul.f32 %v413_v15, %v371_v0 }
 0x119   : > { %v427_v1 = vpack.c.bf16 %v419_v6, %v418_v5  ;;  %v428_v12 = vpack.c.bf16 %v421_v8, %v420_v9  ;;  %v429_v16 = vpack.c.bf16 %v423_v13, %v422_v14  ;;  %v430_v19 = vpack.c.bf16 %v425_v17, %v424_v18 }
 0x11b   : > { %694 = vmatpush3.bf16.msra.mxu0 %v427_v1 }
 0x11c   : > { %695 = vmatprep.subr.bf16.mxu0 %v964_v4 }
 0x11f   : > { %696 = vmatpush3.bf16.msra.mxu0 %v428_v12 }
 0x120   : > { %697 = vmatprep.subr.bf16.mxu0 %v964_v4 }
 0x123   : > { %698 = vmatpush3.bf16.msra.mxu0 %v429_v16 }
 0x124   : > { %699 = vmatprep.subr.bf16.mxu0 %v964_v4  ;;  %v673_v4 = vld [vmem:[%s1286_s6] ss:$0 sm:$0xff] }
 0x127   : > { %700 = vmatpush3.bf16.msra.mxu0 %v430_v19 }
 0x12a   : > { %702 = vmatmul.mubr.msk.bf16.vlgmr.msra.gmra.mrb[0].mxu0 %vm431_vm1, %v426_v20 }
 0x1fd   : > { %v469_v24 = vpop.f32.mrb[0].mxu0 }
 0x1fe   : > { %v475_v25 = vpack.c.bf16 %v469_v24, %v469_v24  ;;  %v703_v26 = vpop.f32.mrb[1].mxu0 }
 0x1ff   : > { %v472_v27 = vpop.f32.mrb[2].mxu0 }
 0x200   : > { %v704_v28 = vpop.f32.mrb[3].mxu0  ;;  %722 = vmatmul.mubr.bf16.vlgmr.msra.gmra.mrb[0].mxu1 %v475_v25 }
 0x2d3   : > { %v541_v29 = vpop.f32.mrb[0].mxu1 }
 0x2d4   : > { %v542_v31 = vadd.f32 %v673_v4, %v541_v29  ;;  %v723_v32 = vpop.f32.mrb[1].mxu1 }
 0x2d5   : > { %v544_v33 = vpop.f32.mrb[2].mxu1 }
 0x2d6   : > { %v550_v34 = vadd.f32 %v549_v30, %v542_v31  ;;  %v724_v35 = vpop.f32.mrb[3].mxu1 }
 0x2d8   : > { %551 = vst [vmem:[%s322_s29] sm:$0xff] %v550_v34 }
 0x2d9   : > { %900 = shalt.err (!%p897_p2)
}
 0x2da   : > { %s901_s12 = scalar_lea.hbm %s1236_s11, 128  ;;  %s905_s14 = scalar_lea.hbm %s1287_s7, 256 }
 0x2db   : > { %p902_p13 = scmp.ne.s32.totalorder %s1236_s11, %s901_s12  ;;  %p906_p4 = scmp.lt.u32.totalorder %s1236_s11, %s1287_s7 }
 0x2dc   : > { %p907_p5 = scmp.lt.u32.totalorder %s905_s14, %s901_s12  ;;  %p909_p11 = scmp.lt.u32.totalorder %s901_s12, %s1236_s11 }
 0x2dd   : > { %p903_p6 = pnand %p902_p13, %p1301_p0 }
 0x2de   : > { %p908_p8 = por %p907_p5, %p906_p4 }
 0x2df   : > { %p904_p10 = pneg %p903_p6 }
 0x2e0   : > { %p910_p1 = por %p909_p11, %p908_p8 }
 0x2e2   : > { %p911_p3 = pnand %p910_p1, %p904_p10 }
 0x2e4   : > { %914 = shalt.err (!%p911_p3)
}
 0x2e5   : > { %735 = dma.vmem_to_hbm [thread:$0]  (%p1301_p0), %s1238_s30, 128, %s1236_s11, %s553_s22  }
 0x2e6 PF: > { %s578_s9 = sand.u32 1, %s945_s24   ;;  %p1302_p7 = scmp.ne.s32.totalorder %s1292_s8, 0 }
 0x2e7   : > { %p1303_p9 = scmp.ge.s32.totalorder %s957_s27, 2  ;;  %s579_s20 = scalar_lea.sflag [#allocation4], %s578_s9 }
 0x2e9   : > { %p749_p12 = pnand %p1303_p9, %p1302_p7 }
 0x2eb   : > { %940 = dma.done.wait (!%p749_p12), %s579_s20, 128  }
 0x2ec   : > { %942 = vsyncadd (!%p749_p12), %s579_s20, 4294967168  ;;  %p21_p2 = scmp.ge.s32.totalorder %s1118_s13, 4   ;;  %s1304_s24 = smov %s949_s25 }
 0x2ed   : > { %s1305_s25 = smov %s953_s26  ;;  %s1306_s26 = smov %s1134_s17 }
 0x2ee   : > { %s1307_s27 = smov %s1118_s13  ;;  %23 = sbr.rel (!%p21_p2) target bundleno = 6 (0x6), region = 102 }
 0x2f5   :  { %584 = vsyncpa [#allocation3], 1 }
 0x2f6   :  { %586 = vsyncpa [#allocation3 + $0x1], 1 }
 0x2f7   :  { %587 = vsyncpa [#allocation6], 1 }
 0x2f8   :  { %588 = vsyncpa [#allocation4], 1 }
 0x2f9   :  { %590 = vsyncpa [#allocation4 + $0x1], 1 }

</bundles_post_ra>
